<compile_context>
chip_gen: v7x
topology: tpu7x:2x2x1
jax: 0.10.0
libtpu: 0.0.40
codegen_flags: <defaults>
</compile_context>

<pallas_src>
import functools

import jax
import jax.numpy as jnp
from jax.experimental import pallas as pl
from jax.experimental.pallas import tpu as pltpu


def _round_up(x, m):
    return (x + m - 1) // m * m


def _cdiv(a, b):
    return -(-a // b)


def suppress_kernel(x_ref, w1_ref, b1_ref, w2_ref, b2_ref, o_ref):
    # x_ref : [S, TM]   (instances m = b*C + c on lanes, seglen on sublanes)
    # w1_ref: [E, S]    (torch mlp1.weight layout, [out, in])
    # b1_ref: [E, 1]
    # w2_ref: [E, 1]    (torch mlp2.weight transposed)
    # b2_ref: [1]       (SMEM scalar)
    # o_ref : [1, TM]   (lane-dense output row)
    x = x_ref[...].astype(jnp.float32)                            # upcast if bf16

    # InstanceNorm1d statistics: per-lane (per (b, c) instance) over S sublanes.
    mean = jnp.mean(x, axis=0, keepdims=True)                     # [1, TM]
    ex2 = jnp.mean(x * x, axis=0, keepdims=True)                  # [1, TM]
    var = jnp.maximum(ex2 - mean * mean, 0.0)                     # biased variance
    rinv = jax.lax.rsqrt(var + 1e-5)                              # [1, TM]

    # mlp1 + ReLU with the normalization folded into the matmul:
    #   h = W1 @ ((x - mean) * rinv) + b1
    #     = rinv * (W1 @ x) - (rinv * mean) * rowsum(W1) + b1
    # MXU matmul on raw x with the full lane width (TM) as N; no [S,TM] temp.
    g = jnp.dot(w1_ref[...], x, preferred_element_type=jnp.float32)   # [E, TM]
    w1_rowsum = jnp.sum(w1_ref[...], axis=1, keepdims=True)           # [E, 1], tiny
    h = rinv * g - (rinv * mean) * w1_rowsum + b1_ref[...]            # [E, TM]
    h = jnp.maximum(h, 0.0)

    # mlp2 + Sigmoid. The N=1 matmul is a VPU multiply + sublane reduce instead
    # of a 1-column MXU op.
    z = jnp.sum(h * w2_ref[...], axis=0, keepdims=True) + b2_ref[0]   # [1, TM]
    o_ref[...] = jax.nn.sigmoid(z).astype(o_ref.dtype)


@functools.partial(jax.jit, static_argnames=("tm",))
def suppress_net_forward(inputs, w1, b1, w2, b2, *, tm=16384):
    """inputs: [B, S, C] (C == n_class); returns [B, C] sigmoid scores."""
    B, S, C = inputs.shape
    E = w1.shape[0]
    M = B * C

    # Leading-axis transpose only (minor axis untouched): [B,S,C] -> [S,B,C] -> [S,M].
    # Being inside this jit, XLA fuses transpose + pad into a single copy feeding
    # the pallas_call (no separate full HBM round trips).
    x2d = jnp.transpose(inputs, (1, 0, 2)).reshape(S, M)

    # Lane tiling:
    #   * tm is the per-step cap (big: the kernel is per-step-overhead bound).
    #   * keep >= 2 grid steps whenever more than one 128-lane group is needed,
    #     so both v7x TensorCores get work via dimension_semantics=("parallel",).
    #   * TM = cdiv(M, n_tiles) rounded up to 128 minimizes lane padding waste.
    tm = max(128, _round_up(tm, 128))
    M128 = _round_up(M, 128)
    n_tiles = _cdiv(M128, tm)
    if M128 > 128:
        n_tiles = max(n_tiles, 2)
    TM = _round_up(_cdiv(M128, n_tiles), 128)
    M_pad = n_tiles * TM

    # Padded lanes are harmless: all math is per-lane over sublanes, zero lanes
    # produce finite garbage that is sliced off below.
    if M_pad != M:
        x2d = jnp.pad(x2d, ((0, 0), (0, M_pad - M)))

    grid = (n_tiles,)

    out = pl.pallas_call(
        suppress_kernel,
        out_shape=jax.ShapeDtypeStruct((1, M_pad), jnp.float32),
        grid=grid,
        in_specs=[
            # x: pipelined over M.  If DMA ever shows up exposed at moderate TM,
            # add pipeline_mode=pl.Buffered(3) here (VMEM headroom is huge).
            pl.BlockSpec((S, TM), lambda i: (0, i)),
            pl.BlockSpec((E, S), lambda i: (0, 0)),             # w1: VMEM-resident
            pl.BlockSpec((E, 1), lambda i: (0, 0)),             # b1
            pl.BlockSpec((E, 1), lambda i: (0, 0)),             # w2
            pl.BlockSpec(memory_space=pltpu.MemorySpace.SMEM),  # b2 scalar in SMEM
        ],
        out_specs=pl.BlockSpec((1, TM), lambda i: (0, i)),      # lane-dense output
        compiler_params=pltpu.CompilerParams(
            dimension_semantics=("parallel",),   # independent M tiles (v7x megacore)
            vmem_limit_bytes=32 * 1024 * 1024,   # safe for v5e/v6e (128 MiB) & v7x (64 MiB)
        ),
    )(x2d, w1, b1, w2, b2)

    return out[0, :M].reshape(B, C)


def _reference(inputs, w1, b1, w2, b2):
    # Pure-JAX reference of the same math, for a sanity check.
    x = jnp.transpose(inputs, (0, 2, 1)).astype(jnp.float32)      # [B, C, S]
    mean = jnp.mean(x, axis=-1, keepdims=True)
    var = jnp.mean((x - mean) ** 2, axis=-1, keepdims=True)
    xn = (x - mean) / jnp.sqrt(var + 1e-5)
    h = jnp.maximum(jnp.einsum("bcs,es->bce", xn, w1) + b1[:, 0], 0.0)   # [B, C, E]
    z = jax.nn.sigmoid(jnp.einsum("bce,e->bc", h, w2[:, 0]) + b2[0])     # [B, C]
    return z


if __name__ == "__main__":
    # opt = {'num_of_class': 5, 'segment_size': 8}
    num_of_class = 5
    segment_size = 8
    n_class = num_of_class - 1          # 4
    S = segment_size                     # 8
    E = 2 * S                            # 16 (n_embedding_dim)
    B = 2

    key = jax.random.PRNGKey(0)
    k_in, k_w1, k_b1, k_w2, k_b2, k_in2 = jax.random.split(key, 6)

    # Deterministic synthetic parameters in the layouts the kernel expects:
    #   w1: [E, S]  (== torch mlp1.weight, [out, in])
    #   b1: [E, 1]  (torch mlp1.bias as a column)
    #   w2: [E, 1]  (== torch mlp2.weight.T)
    #   b2: [1]     (torch mlp2.bias)
    bound1 = 1.0 / float(jnp.sqrt(S))
    bound2 = 1.0 / float(jnp.sqrt(E))
    w1 = jax.random.uniform(k_w1, (E, S), jnp.float32, -bound1, bound1)
    b1 = jax.random.uniform(k_b1, (E, 1), jnp.float32, -bound1, bound1)
    w2 = jax.random.uniform(k_w2, (E, 1), jnp.float32, -bound2, bound2)
    b2 = jax.random.uniform(k_b2, (1,), jnp.float32, -bound2, bound2)

    # Example input consistent with the module: [B, segment_size, n_class]
    x = jax.random.normal(k_in, (B, S, n_class), jnp.float32)

    out = suppress_net_forward(x, w1, b1, w2, b2)
    out = jax.block_until_ready(out)
    ref = _reference(x, w1, b1, w2, b2)
    assert out.shape == (B, n_class)
    assert jnp.allclose(out, ref, atol=1e-4, rtol=1e-4), "mismatch vs reference"

    # Second (still small) batch that exercises the multi-tile / padded path
    # (M = 96*4 = 384 lanes -> 2 grid steps).
    B2 = 96
    x2 = jax.random.normal(k_in2, (B2, S, n_class), jnp.float32)
    out2 = jax.block_until_ready(suppress_net_forward(x2, w1, b1, w2, b2))
    ref2 = _reference(x2, w1, b1, w2, b2)
    assert out2.shape == (B2, n_class)
    assert jnp.allclose(out2, ref2, atol=1e-4, rtol=1e-4), "mismatch vs reference (tiled)"

    print("KERNEL_OK")
</pallas_src>

<mosaic_0001>
module attributes {stable_mosaic.version = 11 : i64} {
  func.func @suppress_kernel(%arg0: i32, %arg1: memref<8x128xf32, #tpu.memory_space<vmem>>, %arg2: memref<16x8xf32, #tpu.memory_space<vmem>>, %arg3: memref<16x1xf32, #tpu.memory_space<vmem>>, %arg4: memref<16x1xf32, #tpu.memory_space<vmem>>, %arg5: memref<1xf32, #tpu.memory_space<smem>>, %arg6: memref<1x128xf32, #tpu.memory_space<vmem>>) attributes {dimension_semantics = [#tpu.dimension_semantics<parallel>], iteration_bounds = array<i64: 1>, scalar_prefetch = 0 : i64, scratch_operands = 0 : i64, tpu.core_type = #tpu.core_type<tc>, window_params = [{transform_indices = @transform_0, window_bounds = array<i64: 8, 128>}, {pipeline_mode = #tpu.pipeline_mode<synchronous>, transform_indices = @transform_1, window_bounds = array<i64: 16, 8>}, {pipeline_mode = #tpu.pipeline_mode<synchronous>, transform_indices = @transform_2, window_bounds = array<i64: 16, 1>}, {pipeline_mode = #tpu.pipeline_mode<synchronous>, transform_indices = @transform_3, window_bounds = array<i64: 16, 1>}, {transform_indices = @transform_4, window_bounds = array<i64: 1>}, {transform_indices = @transform_5, window_bounds = array<i64: 1, 128>}]} {
    %c0 = arith.constant 0 : index
    %c0_0 = arith.constant 0 : index
    %0 = vector.load %arg1[%c0, %c0_0] : memref<8x128xf32, #tpu.memory_space<vmem>>, vector<8x128xf32>
    %cst = arith.constant dense<0.000000e+00> : vector<128xf32>
    %1 = vector.multi_reduction <add>, %0, %cst [0] : vector<8x128xf32> to vector<128xf32>
    %2 = vector.shape_cast %1 : vector<128xf32> to vector<1x128xf32>
    %cst_1 = arith.constant 8.000000e+00 : f32
    %3 = vector.broadcast %cst_1 : f32 to vector<1x128xf32>
    %4 = arith.divf %2, %3 : vector<1x128xf32>
    %5 = arith.mulf %0, %0 : vector<8x128xf32>
    %cst_2 = arith.constant dense<0.000000e+00> : vector<128xf32>
    %6 = vector.multi_reduction <add>, %5, %cst_2 [0] : vector<8x128xf32> to vector<128xf32>
    %7 = vector.shape_cast %6 : vector<128xf32> to vector<1x128xf32>
    %cst_3 = arith.constant 8.000000e+00 : f32
    %8 = vector.broadcast %cst_3 : f32 to vector<1x128xf32>
    %9 = arith.divf %7, %8 : vector<1x128xf32>
    %10 = arith.mulf %4, %4 : vector<1x128xf32>
    %11 = arith.subf %9, %10 : vector<1x128xf32>
    %cst_4 = arith.constant 0.000000e+00 : f32
    %12 = vector.broadcast %cst_4 : f32 to vector<1x128xf32>
    %13 = arith.maximumf %11, %12 : vector<1x128xf32>
    %cst_5 = arith.constant 9.99999974E-6 : f32
    %14 = vector.broadcast %cst_5 : f32 to vector<1x128xf32>
    %15 = arith.addf %13, %14 : vector<1x128xf32>
    %16 = math.rsqrt %15 : vector<1x128xf32>
    %c0_6 = arith.constant 0 : index
    %c0_7 = arith.constant 0 : index
    %17 = vector.load %arg2[%c0_6, %c0_7] : memref<16x8xf32, #tpu.memory_space<vmem>>, vector<16x8xf32>
    %cst_8 = arith.constant dense<0.000000e+00> : vector<16x128xf32>
    %18 = tpu.matmul %17, %0, %cst_8 {dimension_numbers = #tpu.dot_dimension_numbers<[1], [0], [0], [1], [0, 0, 1, 1], [], []>} : vector<16x8xf32>, vector<8x128xf32>, vector<16x128xf32> -> vector<16x128xf32>
    %c0_9 = arith.constant 0 : index
    %c0_10 = arith.constant 0 : index
    %19 = vector.load %arg2[%c0_9, %c0_10] : memref<16x8xf32, #tpu.memory_space<vmem>>, vector<16x8xf32>
    %cst_11 = arith.constant dense<0.000000e+00> : vector<16xf32>
    %20 = vector.multi_reduction <add>, %19, %cst_11 [1] : vector<16x8xf32> to vector<16xf32>
    %21 = vector.shape_cast %20 : vector<16xf32> to vector<16x1xf32>
    %22 = vector.broadcast %16 : vector<1x128xf32> to vector<16x128xf32>
    %23 = arith.mulf %22, %18 : vector<16x128xf32>
    %24 = arith.mulf %16, %4 : vector<1x128xf32>
    %25 = vector.broadcast %24 : vector<1x128xf32> to vector<16x128xf32>
    %26 = vector.broadcast %21 : vector<16x1xf32> to vector<16x128xf32>
    %27 = arith.mulf %25, %26 : vector<16x128xf32>
    %28 = arith.subf %23, %27 : vector<16x128xf32>
    %c0_12 = arith.constant 0 : index
    %c0_13 = arith.constant 0 : index
    %29 = vector.load %arg3[%c0_12, %c0_13] : memref<16x1xf32, #tpu.memory_space<vmem>>, vector<16x1xf32>
    %30 = vector.broadcast %29 : vector<16x1xf32> to vector<16x128xf32>
    %31 = arith.addf %28, %30 : vector<16x128xf32>
    %cst_14 = arith.constant 0.000000e+00 : f32
    %32 = vector.broadcast %cst_14 : f32 to vector<16x128xf32>
    %33 = arith.maximumf %31, %32 : vector<16x128xf32>
    %c0_15 = arith.constant 0 : index
    %c0_16 = arith.constant 0 : index
    %34 = vector.load %arg4[%c0_15, %c0_16] : memref<16x1xf32, #tpu.memory_space<vmem>>, vector<16x1xf32>
    %35 = vector.broadcast %34 : vector<16x1xf32> to vector<16x128xf32>
    %36 = arith.mulf %33, %35 : vector<16x128xf32>
    %cst_17 = arith.constant dense<0.000000e+00> : vector<128xf32>
    %37 = vector.multi_reduction <add>, %36, %cst_17 [0] : vector<16x128xf32> to vector<128xf32>
    %38 = vector.shape_cast %37 : vector<128xf32> to vector<1x128xf32>
    %c0_18 = arith.constant 0 : index
    %39 = memref.load %arg5[%c0_18] : memref<1xf32, #tpu.memory_space<smem>>
    %40 = vector.broadcast %39 : f32 to vector<1x128xf32>
    %41 = arith.addf %38, %40 : vector<1x128xf32>
    %42 = arith.negf %41 : vector<1x128xf32>
    %43 = math.exp %42 : vector<1x128xf32>
    %cst_19 = arith.constant 1.000000e+00 : f32
    %44 = vector.broadcast %cst_19 : f32 to vector<1x128xf32>
    %45 = arith.addf %44, %43 : vector<1x128xf32>
    %46 = arith.divf %44, %45 : vector<1x128xf32>
    %c0_20 = arith.constant 0 : index
    %c0_21 = arith.constant 0 : index
    %47 = vector.load %arg6[%c0_20, %c0_21] : memref<1x128xf32, #tpu.memory_space<vmem>>, vector<1x128xf32>
    tpu.vector_store %arg6[%c0_20, %c0_21], %46 {strides = array<i32>} : memref<1x128xf32, #tpu.memory_space<vmem>>, vector<1x128xf32>,
    return
  }
  func.func @transform_0(%arg0: i32) -> (i32, i32) {
    %c0_i32 = arith.constant 0 : i32
    %c0_i32_0 = arith.constant 0 : i32
    return %c0_i32, %arg0 : i32, i32
  }
  func.func @transform_1(%arg0: i32) -> (i32, i32) {
    %c0_i32 = arith.constant 0 : i32
    %c0_i32_0 = arith.constant 0 : i32
    %c0_i32_1 = arith.constant 0 : i32
    return %c0_i32, %c0_i32_0 : i32, i32
  }
  func.func @transform_2(%arg0: i32) -> (i32, i32) {
    %c0_i32 = arith.constant 0 : i32
    %c0_i32_0 = arith.constant 0 : i32
    %c0_i32_1 = arith.constant 0 : i32
    return %c0_i32, %c0_i32_0 : i32, i32
  }
  func.func @transform_3(%arg0: i32) -> (i32, i32) {
    %c0_i32 = arith.constant 0 : i32
    %c0_i32_0 = arith.constant 0 : i32
    %c0_i32_1 = arith.constant 0 : i32
    return %c0_i32, %c0_i32_0 : i32, i32
  }
  func.func @transform_4(%arg0: i32) -> i32 {
    %c0_i32 = arith.constant 0 : i32
    %c0_i32_0 = arith.constant 0 : i32
    return %c0_i32 : i32
  }
  func.func @transform_5(%arg0: i32) -> (i32, i32) {
    %c0_i32 = arith.constant 0 : i32
    %c0_i32_0 = arith.constant 0 : i32
    return %c0_i32, %arg0 : i32, i32
  }
}

</mosaic_0001>

<bundles_post_ra>
// kernel: squeeze.1
= control target key start
LH: loop header
LB: loop body
LE: loop exit
PB: predicated region body
PF: predicated region fallthrough
CT: control target
= control target key end

     0   :  { %s85_s0 = inlined_call_operand.vmem [shape: f32[8], index: 0, kind: input, shape index: {}]   ;;  %s86_s1 = inlined_call_operand.hbm [shape: f32[2,4], index: 1, kind: output, shape index: {}]  }
   0x1   :  { %v5_v0 = vld [vmem:[%s85_s0] sm:$0x1] }
   0x2   :  { %2 = vsyncpa [#allocation1], 0  ;;  %6 = vst [vmem:[#allocation3] sm:$0x1] %v5_v0  ;;  %vm8_vm0 = vcmask 31744   ;;  %s58_s0 = smov 124  }
   0x3   :  { %s59_s8 = smov [#allocation0]  }
   0x4   :  { %s26_s9 = sshll.u32 %s59_s8, 4  ;;  %s27_s9 = int_to_ptr.vmem [resolvable:$true] %s26_s9 }
   0x5   :  { %s34_s10 = scalar_lea.vmem %s27_s9, 32  ;;  %p39_p1 = scmp.lt.s32.totalorder %s27_s9, %s27_s9 }
   0x6   :  { %p35_p0 = scmp.ne.s32.totalorder %s27_s9, %s34_s10  ;;  %p40_p2 = scmp.lt.s32.totalorder %s34_s10, %s34_s10 }
   0x8   :  { %p41_p3 = por %p40_p2, %p39_p1 }
   0x9   :  { %v10_v1 = vld [vmem:[#allocation3] sm:$0x1]  }
   0xa   :  { %v7_v2 = vld [vmem:[#allocation3] sm:$0x1]   ;;  %11 = vrot.lane.b32.xlu0 %v10_v1, %s58_s0  ;;  %p42_p4 = pnand %p41_p3, %p35_p0 }
   0xb   :  { %9 = vst.msk [vmem:[#allocation2] sm:$0x1] %vm8_vm0, %v7_v2  }
  0x7c   :  { %v12_v3 = vpop.permute.xlu0 %11  }
  0x7d   :  { %15 = vst.msk [vmem:[#allocation2 + $0x1] sm:$0x1] %vm8_vm0, %v12_v3  }
  0x84   :  { %v19_v4 = vld [vmem:[#allocation2] sm:$0x3] }
  0x85   :  { %21 = vst [vmem:[#allocation0] sm:$0x3] %v19_v4 }
  0x86   :  { %45 = shalt.err (!%p42_p4)
}
  0x87   :  { %s46_s13 = scalar_lea.hbm %s86_s1, 32 }
  0x88   :  { %p47_p5 = scmp.ne.s32.totalorder %s86_s1, %s46_s13  ;;  %p50_p6 = scmp.lt.u32.totalorder %s46_s13, %s86_s1 }
  0x8a   :  { %p52_p7 = pnand %p50_p6, %p47_p5 }
  0x8c   :  { %55 = shalt.err (!%p52_p7)
}
  0x8d   :  { %29 = dma.vmem_to_hbm [thread:$0]  %s27_s9, 32, %s86_s1, [#allocation1]  }
  0x8e   :  { %56 = dma.done.wait [#allocation1], 32  }
  0x8f   :  { %57 = vsyncadd [#allocation1], 4294967264 }
  0x90   :  { %31 = vsyncpa [#allocation1], 1 }

// kernel: suppress_net_forward.1
= control target key start
LH: loop header
LB: loop body
LE: loop exit
PB: predicated region body
PF: predicated region fallthrough
CT: control target
= control target key end

     0   :  { %vm45_vm0 = vcmask 64512   ;;  %v211_v3 = vmov 0   ;;  %s269_s0 = inlined_call_operand.vmem [shape: f32[8,128], index: 0, kind: input, shape index: {}]   ;;  %s270_s1 = inlined_call_operand.vmem [shape: f32[16,8], index: 1, kind: input, shape index: {}]   ;;  %s271_s2 = inlined_call_operand.vmem [shape: f32[16,1], index: 2, kind: input, shape index: {}]   ;;  %s272_s3 = inlined_call_operand.vmem [shape: f32[16,1], index: 3, kind: input, shape index: {}]   ;;  %s273_s4 = inlined_call_operand.<no memory space> [shape: f32[1], index: 4, kind: input, shape index: {}]   ;;  %s274_s5 = inlined_call_operand.vmem [shape: f32[1,128], index: 5, kind: output, shape index: {}]  }
   0x1   :  { %v21_v0 = vld [vmem:[%s269_s0] sm:$0xff]  ;;  %v44_v2 = vld [vmem:[%s270_s1 + $0x8] sm:$0xff]  ;;  %203 = vset.pattern.permute.xlu1 %v211_v3  ;;  %204 = vset.pattern.permute.xlu0 %v211_v3  ;;  %v178_v57 = vstv %s273_s4 }
   0x2   :  { %v43_v1 = vld [vmem:[%s270_s1] sm:$0xff]  ;;  %197 = vmatprep.subr.mxu0 %v21_v0  ;;  %v130_v6 = vsel %vm45_vm0, %v44_v2, 0.0  ;;  %v141_v7 = vld [vmem:[%s271_s2 + $0x8] sm:$0xff]  ;;  %v30_v10 = vmul.f32 %v21_v0, %v21_v0  ;;  %v22_v11 = vrot.slane %v21_v0, 4 }
   0x3   :  { %199 = vmatprep.mubr.msk.f32.mxu0 %vm45_vm0, %v43_v1  ;;  %v127_v4 = vsel %vm45_vm0, %v43_v1, 0.0  ;;  %v140_v5 = vld [vmem:[%s271_s2] sm:$0xff]  ;;  %198 = vmatpush3.msra.mxu0 %v21_v0  ;;  %v157_v8 = vld [vmem:[%s272_s3 + $0x8] sm:$0xff] }
   0x4   :  { %128 = vadd.xlane.f32.xlu0 %v127_v4  ;;  %200 = vmatmul.mubr.msk.f32.vlgmr.msra.gmra.mrb[0].mxu0 %vm45_vm0, %v44_v2  ;;  %v156_v9 = vld [vmem:[%s272_s3] sm:$0xff]  ;;  %v31_v12 = vrot.slane %v30_v10, 4  ;;  %v23_v13 = vadd.f32 %v22_v11, %v21_v0 }
   0x5   :  { %144 = vperm.xlu1 %203, %v140_v5  }
   0x6   :  { %v32_v14 = vadd.f32 %v31_v12, %v30_v10  ;;  %v24_v15 = vrot.slane %v23_v13, 2 }
   0x8   :  { %131 = vadd.xlane.f32.xlu0 %v130_v6  ;;  %v25_v16 = vadd.f32 %v24_v15, %v23_v13  ;;  %v33_v17 = vrot.slane %v32_v14, 2 }
   0x9   :  { %149 = vperm.xlu1 %203, %v141_v7  }
   0xa   :  { %v26_v18 = vrot.slane %v25_v16, 1  ;;  %v34_v19 = vadd.f32 %v33_v17, %v32_v14 }
   0xc   :  { %v27_v20 = vadd.f32 %v26_v18, %v25_v16  ;;  %v35_v21 = vrot.slane %v34_v19, 1 }
   0xd   :  { %165 = vperm.xlu1 %203, %v157_v8  }
   0xe   :  { %v29_v22 = vmul.f32 0.125, %v27_v20  ;;  %v36_v23 = vadd.f32 %v35_v21, %v34_v19 }
  0x10   :  { %v37_v24 = vmul.f32 0.125, %v36_v23  ;;  %v38_v25 = vmul.f32 %v29_v22, %v29_v22 }
  0x12   :  { %v39_v26 = vsub.f32 %v37_v24, %v38_v25 }
  0x14   :  { %v40_v27 = vmax.f32 %v39_v26, 0.0 }
  0x16   :  { %v41_v28 = vadd.f32 1e-05, %v40_v27 }
  0x18   :  { %205 = vrsqrt.f32 %v41_v28 }
  0x1e   :  { %160 = vperm.xlu0 %204, %v156_v9  }
  0x22   :  { %v206_v30 = vpop.eup %205 }
  0x23   :  { %v135_v33 = vmul.f32 %v206_v30, %v29_v22 }
  0x84   :  { %v145_v31 = vpop.permute.xlu1 %144 }
  0x88   :  { %v150_v39 = vpop.permute.xlu1 %149 }
  0x8c   :  { %v166_v47 = vpop.permute.xlu1 %165 }
  0x91   :  { %v129_v29 = vpop.xlane.xlu0 %128 }
  0x92   :  { %v136_v38 = vmul.f32 %v135_v33, %v129_v29 }
  0x95   :  { %v132_v32 = vpop.xlane.xlu0 %131 }
  0x96   :  { %v137_v34 = vmul.f32 %v135_v33, %v132_v32 }
  0x9d   :  { %v161_v46 = vpop.permute.xlu0 %160 }
  0xd7   :  { %v201_v35 = vpop.f32.mrb[0].mxu0 }
  0xd8   :  { %v134_v36 = vmul.f32 %v206_v30, %v201_v35  ;;  %v118_v37 = vpop.f32.mrb[1].mxu0 }
  0xd9   :  { %v133_v40 = vmul.f32 %v206_v30, %v118_v37 }
  0xda   :  { %v139_v41 = vsub.f32 %v134_v36, %v137_v34 }
  0xdb   :  { %v138_v42 = vsub.f32 %v133_v40, %v136_v38 }
  0xdc   :  { %v153_v43 = vadd.f32 %v150_v39, %v139_v41 }
  0xdd   :  { %v152_v44 = vadd.f32 %v145_v31, %v138_v42 }
  0xde   :  { %v155_v45 = vmax.f32 %v153_v43, 0.0 }
  0xdf   :  { %v154_v48 = vmax.f32 %v152_v44, 0.0 }
  0xe0   :  { %v169_v49 = vmul.f32 %v166_v47, %v155_v45 }
  0xe1   :  { %v168_v50 = vmul.f32 %v161_v46, %v154_v48 }
  0xe3   :  { %v170_v51 = vadd.f32 %v169_v49, %v168_v50 }
  0xe5   :  { %v171_v52 = vrot.slane %v170_v51, 4 }
  0xe7   :  { %v172_v53 = vadd.f32 %v171_v52, %v170_v51 }
  0xe9   :  { %v173_v54 = vrot.slane %v172_v53, 2 }
  0xeb   :  { %v174_v55 = vadd.f32 %v173_v54, %v172_v53 }
  0xed   :  { %v175_v56 = vrot.slane %v174_v55, 1 }
  0xef   :  { %v176_v58 = vadd.f32 %v175_v56, %v174_v55 }
  0xf1   :  { %v179_v59 = vadd.f32 %v178_v57, %v176_v58 }
  0xf3   :  { %v193_v60 = vmul.f32 -1.442695, %v179_v59 }
  0xf5   :  { %207 = vpow2.f32 %v193_v60 }
  0xff   :  { %v208_v61 = vpop.eup %207 }
 0x100   :  { %v183_v62 = vadd.f32 1.0, %v208_v61 }
 0x102   :  { %209 = vrcp.f32 %v183_v62 }
 0x10c   :  { %v210_v63 = vpop.eup %209 }
 0x10d   :  { %186 = vst [vmem:[%s274_s5] sm:$0x1] %v210_v63 }

</bundles_post_ra>
